<compile_context>
chip_gen: v7x
topology: tpu7x:2x2x1
jax: 0.10.0
libtpu: 0.0.40
codegen_flags: <defaults>
</compile_context>

<pallas_src>
import functools

import jax
import jax.numpy as jnp
from jax.experimental import pallas as pl
from jax.experimental.pallas import tpu as pltpu

EPS = 10.0
UNNORM_STD = 2.0
UNNORM_MEAN = 5.0
assert UNNORM_STD > 0, "algebraic fold of unnormalize requires UNNORM_STD > 0"

_LANES = 128
_DEF_TILE_ROWS = 4096  # 4096 x 128 f32 = 2 MiB per input block
_FOLD_C = (UNNORM_MEAN + EPS) / UNNORM_STD


def _mape_kernel(p_ref, l_ref, o_ref, *, rows_main, tile_rows,
                 blocks_per_split, need_mask):
    """Accumulate per-split partial sums of |p-l|/(l+c) into a (8,128) block."""
    c = pl.program_id(0)          # split (TensorCore) index
    k = pl.program_id(1)          # block index within the split (reduction axis)
    block_id = c * blocks_per_split + k

    @pl.when(k == 0)
    def _():
        o_ref[...] = jnp.zeros_like(o_ref)

    cst = jnp.float32(_FOLD_C)

    def tile_partial(masked):
        p = p_ref[...].astype(jnp.float32)
        l = l_ref[...].astype(jnp.float32)
        t = jnp.abs(p - l) / (l + cst)
        if masked:
            # Row-index mask only (main region is whole 128-lane rows); garbage
            # rows beyond rows_main are discarded by the select (no NaN/Inf
            # propagation into the sum).
            row = jax.lax.broadcasted_iota(jnp.int32, (tile_rows, _LANES), 0)
            t = jnp.where(block_id * tile_rows + row < rows_main, t, 0.0)
        # Fold groups of 8 sublane rows: (8,128)-tile-preserving reshape, pure
        # VPU vreg adds, no per-step cross-lane XLU reduce.
        return t.reshape(tile_rows // 8, 8, _LANES).sum(axis=0)

    if need_mask:
        in_bounds = (block_id + 1) * tile_rows <= rows_main

        @pl.when(in_bounds)
        def _():
            o_ref[...] += tile_partial(False)

        @pl.when(jnp.logical_not(in_bounds))
        def _():
            # Boundary block (partially valid) or phantom block of the second
            # split (fully masked -> contributes exactly 0).
            o_ref[...] += tile_partial(True)
    else:
        o_ref[...] += tile_partial(False)


def mape_loss(predict, label, *, tile_rows=_DEF_TILE_ROWS):
    """MAPE loss: mean(|unnorm(predict) - unnorm(label)| / (unnorm(label)+EPS))."""
    assert predict.shape == label.shape
    n = predict.size
    cst = jnp.float32(_FOLD_C)

    # Sublane alignment depends on packing (f32 -> 8 rows, bf16 -> 16, i8 -> 32).
    itemsize = jnp.dtype(predict.dtype).itemsize
    row_align = max(8, 32 // max(itemsize, 1))
    chunk = row_align * _LANES

    rows_main = (n // chunk) * row_align        # rows streamed by the kernel
    main_elems = rows_main * _LANES

    pf = predict.reshape(-1)
    lf = label.reshape(-1)

    # Tail (< row_align*128 elements): plain jnp, avoids any pad copy of the
    # full arrays; for aligned n (common case) this is empty and free.
    if main_elems < n:
        tp = pf[main_elems:].astype(jnp.float32)
        tl = lf[main_elems:].astype(jnp.float32)
        tail_sum = jnp.sum(jnp.abs(tp - tl) / (tl + cst))
    else:
        tail_sum = jnp.float32(0.0)

    if rows_main == 0:
        # Input smaller than one aligned row-group: nothing for the kernel.
        return tail_sum / jnp.float32(n)

    p2d = pf[:main_elems].reshape(rows_main, _LANES)   # no-op slice when aligned
    l2d = lf[:main_elems].reshape(rows_main, _LANES)

    tile_rows = min(tile_rows, rows_main)              # stays a multiple of row_align
    blocks_total = pl.cdiv(rows_main, tile_rows)

    # Leading "parallel" axis: v7x megacore streams half the blocks per core;
    # serializes harmlessly on single-TC v5e/v6e.
    n_splits = 2 if blocks_total >= 2 else 1
    bps = pl.cdiv(blocks_total, n_splits)              # blocks per split
    need_mask = (n_splits * bps * tile_rows) != rows_main
    clamp = (n_splits * bps) != blocks_total           # phantom blocks exist

    def in_map(c_, k_):
        b = c_ * bps + k_
        if clamp:
            # Keep the DMA in bounds for phantom blocks of the 2nd split; their
            # contribution is fully masked out in the kernel.
            b = jnp.minimum(b, blocks_total - 1)
        return (b, 0)

    out = pl.pallas_call(
        functools.partial(
            _mape_kernel,
            rows_main=rows_main,
            tile_rows=tile_rows,
            blocks_per_split=bps,
            need_mask=need_mask,
        ),
        out_shape=jax.ShapeDtypeStruct((n_splits * 8, _LANES), jnp.float32),
        grid_spec=pltpu.PrefetchScalarGridSpec(
            num_scalar_prefetch=0,
            grid=(n_splits, bps),
            in_specs=[
                pl.BlockSpec((tile_rows, _LANES), in_map),
                pl.BlockSpec((tile_rows, _LANES), in_map),
            ],
            out_specs=pl.BlockSpec((8, _LANES), lambda c_, k_: (c_, 0)),
        ),
        compiler_params=pltpu.CompilerParams(
            dimension_semantics=("parallel", "arbitrary"),
            vmem_limit_bytes=32 * 1024 * 1024,   # keeps the 4096-row tile safe on v5e too
        ),
    )(p2d, l2d)

    return (jnp.sum(out) + tail_sum) / jnp.float32(n)


def mape_loss_ref(predict, label):
    p = predict.astype(jnp.float32) * UNNORM_STD + UNNORM_MEAN
    l = label.astype(jnp.float32) * UNNORM_STD + UNNORM_MEAN
    return jnp.mean(jnp.abs(p - l) / (l + EPS))


if __name__ == "__main__":
    key = jax.random.PRNGKey(0)
    kp, kl = jax.random.split(key)
    # NCHW inputs, small shapes: batch=2, channels=4, spatial=16x16
    predict = jax.random.normal(kp, (2, 4, 16, 16), dtype=jnp.float32)
    label = jax.random.normal(kl, (2, 4, 16, 16), dtype=jnp.float32)

    loss = jax.block_until_ready(mape_loss(predict, label))
    ref = jax.block_until_ready(mape_loss_ref(predict, label))

    assert jnp.allclose(loss, ref, rtol=1e-5, atol=1e-6), (loss, ref)
    print("KERNEL_OK")
</pallas_src>

<mosaic_0001>
module attributes {stable_mosaic.version = 11 : i64} {
  func.func @_mape_kernel(%arg0: i32, %arg1: i32, %arg2: memref<16x128xf32, #tpu.memory_space<vmem>>, %arg3: memref<16x128xf32, #tpu.memory_space<vmem>>, %arg4: memref<8x128xf32, #tpu.memory_space<vmem>>) attributes {dimension_semantics = [#tpu.dimension_semantics<parallel>, #tpu.dimension_semantics<arbitrary>], iteration_bounds = array<i64: 1, 1>, scalar_prefetch = 0 : i64, scratch_operands = 0 : i64, tpu.core_type = #tpu.core_type<tc>, window_params = [{transform_indices = @transform_0, window_bounds = array<i64: 16, 128>}, {transform_indices = @transform_1, window_bounds = array<i64: 16, 128>}, {transform_indices = @transform_2, window_bounds = array<i64: 8, 128>}]} {
    %c0_i32 = arith.constant 0 : i32
    %0 = arith.cmpi eq, %arg1, %c0_i32 : i32
    %1 = arith.extui %0 : i1 to i32
    %c0_i32_0 = arith.constant 0 : i32
    %2 = arith.cmpi ne, %1, %c0_i32_0 : i32
    scf.if %2 {
      %cst_9 = arith.constant 0.000000e+00 : f32
      %15 = vector.broadcast %cst_9 : f32 to vector<8x128xf32>
      %c0_10 = arith.constant 0 : index
      %c0_11 = arith.constant 0 : index
      %16 = vector.load %arg4[%c0_10, %c0_11] : memref<8x128xf32, #tpu.memory_space<vmem>>, vector<8x128xf32>
      tpu.vector_store %arg4[%c0_10, %c0_11], %15 {strides = array<i32>} : memref<8x128xf32, #tpu.memory_space<vmem>>, vector<8x128xf32>,
    } else {
    }
    %c0 = arith.constant 0 : index
    %c0_1 = arith.constant 0 : index
    %3 = vector.load %arg4[%c0, %c0_1] : memref<8x128xf32, #tpu.memory_space<vmem>>, vector<8x128xf32>
    %c0_2 = arith.constant 0 : index
    %c0_3 = arith.constant 0 : index
    %4 = vector.load %arg2[%c0_2, %c0_3] : memref<16x128xf32, #tpu.memory_space<vmem>>, vector<16x128xf32>
    %c0_4 = arith.constant 0 : index
    %c0_5 = arith.constant 0 : index
    %5 = vector.load %arg3[%c0_4, %c0_5] : memref<16x128xf32, #tpu.memory_space<vmem>>, vector<16x128xf32>
    %6 = arith.subf %4, %5 : vector<16x128xf32>
    %7 = math.absf %6 : vector<16x128xf32>
    %cst = arith.constant 7.500000e+00 : f32
    %8 = vector.broadcast %cst : f32 to vector<16x128xf32>
    %9 = arith.addf %5, %8 : vector<16x128xf32>
    %10 = arith.divf %7, %9 : vector<16x128xf32>
    %11 = vector.shape_cast %10 : vector<16x128xf32> to vector<2x8x128xf32>
    %cst_6 = arith.constant dense<0.000000e+00> : vector<8x128xf32>
    %12 = vector.multi_reduction <add>, %11, %cst_6 [0] : vector<2x8x128xf32> to vector<8x128xf32>
    %13 = arith.addf %3, %12 : vector<8x128xf32>
    %c0_7 = arith.constant 0 : index
    %c0_8 = arith.constant 0 : index
    %14 = vector.load %arg4[%c0_7, %c0_8] : memref<8x128xf32, #tpu.memory_space<vmem>>, vector<8x128xf32>
    tpu.vector_store %arg4[%c0_7, %c0_8], %13 {strides = array<i32>} : memref<8x128xf32, #tpu.memory_space<vmem>>, vector<8x128xf32>,
    return
  }
  func.func @transform_0(%arg0: i32, %arg1: i32) -> (i32, i32) {
    %c1_i32 = arith.constant 1 : i32
    %0 = arith.muli %arg0, %c1_i32 : i32
    %1 = arith.addi %0, %arg1 : i32
    %c0_i32 = arith.constant 0 : i32
    %c0_i32_0 = arith.constant 0 : i32
    return %1, %c0_i32 : i32, i32
  }
  func.func @transform_1(%arg0: i32, %arg1: i32) -> (i32, i32) {
    %c1_i32 = arith.constant 1 : i32
    %0 = arith.muli %arg0, %c1_i32 : i32
    %1 = arith.addi %0, %arg1 : i32
    %c0_i32 = arith.constant 0 : i32
    %c0_i32_0 = arith.constant 0 : i32
    return %1, %c0_i32 : i32, i32
  }
  func.func @transform_2(%arg0: i32, %arg1: i32) -> (i32, i32) {
    %c0_i32 = arith.constant 0 : i32
    %c0_i32_0 = arith.constant 0 : i32
    return %arg0, %c0_i32 : i32, i32
  }
}

</mosaic_0001>

<bundles_post_ra>
// kernel: tpu_custom_call.1
= control target key start
LH: loop header
LB: loop body
LE: loop exit
PB: predicated region body
PF: predicated region fallthrough
CT: control target
= control target key end

     0   :  { %7 = vsyncpa [#allocation3], 0  ;;  %s229_s0 = inlined_call_operand.hbm [shape: f32[16,128], index: 0, kind: input, shape index: {}]   ;;  %s230_s1 = inlined_call_operand.hbm [shape: f32[16,128], index: 1, kind: input, shape index: {}]   ;;  %s231_s2 = inlined_call_operand.hbm [shape: f32[8,128], index: 2, kind: output, shape index: {}]  }
   0x1   :  { %8 = vsyncpa [#allocation6], 0 }
   0x2   :  { %9 = vsyncpa [#allocation4], 0  ;;  %s173_s9 = smov [#allocation2]   ;;  %s101_s13 = scalar_lea.hbm %s229_s0, 256 }
   0x3   :  { %s19_s10 = sshll.u32 %s173_s9, 4  ;;  %p102_p0 = scmp.ne.s32.totalorder %s229_s0, %s101_s13  ;;  %s20_s10 = int_to_ptr.vmem [resolvable:$true] %s19_s10 }
   0x4   :  { %p105_p1 = scmp.lt.u32.totalorder %s101_s13, %s229_s0 }
   0x6   :  { %p107_p2 = pnand %p105_p1, %p102_p0 }
   0x8   :  { %110 = shalt.err (!%p107_p2)
}
   0x9   :  { %s111_s18 = scalar_lea.vmem %s20_s10, 256  ;;  %p116_p4 = scmp.lt.s32.totalorder %s20_s10, %s20_s10 }
   0xa   :  { %p112_p3 = scmp.ne.s32.totalorder %s20_s10, %s111_s18  ;;  %p117_p5 = scmp.lt.s32.totalorder %s111_s18, %s111_s18 }
   0xc   :  { %p118_p6 = por %p117_p5, %p116_p4 }
   0xe   :  { %p119_p7 = pnand %p118_p6, %p112_p3 }
  0x10   :  { %122 = shalt.err (!%p119_p7)
}
  0x11   :  { %s174_s19 = smov 128   ;;  %s175_s20 = smov 8  }
  0x12   :  { %25 = dma.hbm_to_vmem [thread:$0]  %s229_s0, 256, %s20_s10, [#allocation3], %s174_s19, %s174_s19, %s175_s20  }
  0x13   :  { %s176_s23 = smov [#allocation5]   ;;  %s123_s27 = scalar_lea.hbm %s230_s1, 256 }
  0x14   :  { %s35_s24 = sshll.u32 %s176_s23, 4  ;;  %p124_p8 = scmp.ne.s32.totalorder %s230_s1, %s123_s27  ;;  %s36_s24 = int_to_ptr.vmem [resolvable:$true] %s35_s24 }
  0x15   :  { %p127_p9 = scmp.lt.u32.totalorder %s123_s27, %s230_s1 }
  0x17   :  { %p129_p10 = pnand %p127_p9, %p124_p8 }
  0x19   :  { %132 = shalt.err (!%p129_p10)
}
  0x1a   :  { %s133_s4 = scalar_lea.vmem %s36_s24, 256  ;;  %p138_p12 = scmp.lt.s32.totalorder %s36_s24, %s36_s24 }
  0x1b   :  { %p134_p11 = scmp.ne.s32.totalorder %s36_s24, %s133_s4  ;;  %p139_p13 = scmp.lt.s32.totalorder %s133_s4, %s133_s4 }
  0x1d   :  { %p140_p0 = por %p139_p13, %p138_p12 }
  0x1f   :  { %p141_p1 = pnand %p140_p0, %p134_p11 }
  0x21   :  { %144 = shalt.err (!%p141_p1)
}
  0x22   :  { %41 = dma.hbm_to_vmem [thread:$0]  %s230_s1, 256, %s36_s24, [#allocation6], %s174_s19, %s174_s19, %s175_s20  }
  0x23   :  { %167 = dma.done.wait [#allocation3], 256  }
  0x24   :  { %168 = vsyncadd [#allocation3], 4294967040 }
  0x25   :  { %169 = dma.done.wait [#allocation6], 256  }
  0x26   :  { %170 = vsyncadd [#allocation6], 4294967040  ;;  %v60_v0 = vld [vmem:[#allocation5] sm:$0xff]  ;;  %v61_v1 = vld [vmem:[#allocation5 + $0x8] sm:$0xff]  ;;  %s177_s1 = smov [#allocation7]  }
  0x27   :  { %v66_v2 = vadd.f32 7.5, %v60_v0  ;;  %v67_v3 = vadd.f32 7.5, %v61_v1  ;;  %v58_v4 = vld [vmem:[#allocation2] sm:$0xff]  ;;  %v59_v5 = vld [vmem:[#allocation2 + $0x8] sm:$0xff]  ;;  %s81_s6 = sshll.u32 %s177_s1, 4  ;;  %s82_s6 = int_to_ptr.vmem [resolvable:$true] %s81_s6 }
  0x28   :  { %v62_v6 = vsub.f32 %v58_v4, %v60_v0  ;;  %v63_v7 = vsub.f32 %v59_v5, %v61_v1  ;;  %s145_s7 = scalar_lea.vmem %s82_s6, 128  ;;  %p150_p3 = scmp.lt.s32.totalorder %s82_s6, %s82_s6 }
  0x29   :  { %97 = vrcp.f32 %v66_v2  ;;  %p146_p2 = scmp.ne.s32.totalorder %s82_s6, %s145_s7  ;;  %p151_p4 = scmp.lt.s32.totalorder %s145_s7, %s145_s7 }
  0x2a   :  { %99 = vrcp.f32 %v67_v3  ;;  %v64_v8 = vand.u32 2147483647, %v62_v6  ;;  %v65_v9 = vand.u32 2147483647, %v63_v7 }
  0x2b   :  { %p152_p5 = por %p151_p4, %p150_p3 }
  0x2d   :  { %p153_p6 = pnand %p152_p5, %p146_p2 }
  0x33   :  { %v98_v10 = vpop.eup %97 }
  0x34   :  { %v100_v11 = vpop.eup %99  ;;  %v69_v12 = vmul.f32 %v98_v10, %v64_v8 }
  0x35   :  { %v71_v13 = vmul.f32 %v100_v11, %v65_v9 }
  0x37   :  { %v72_v14 = vadd.f32 %v71_v13, %v69_v12 }
  0x39   :  { %74 = vst [vmem:[#allocation7] sm:$0xff] %v72_v14 }
  0x3a   :  { %156 = shalt.err (!%p153_p6)
}
  0x3b   :  { %s157_s10 = scalar_lea.hbm %s231_s2, 128 }
  0x3c   :  { %p158_p7 = scmp.ne.s32.totalorder %s231_s2, %s157_s10  ;;  %p161_p8 = scmp.lt.u32.totalorder %s157_s10, %s231_s2 }
  0x3e   :  { %p163_p9 = pnand %p161_p8, %p158_p7 }
  0x40   :  { %166 = shalt.err (!%p163_p9)
}
  0x41   :  { %84 = dma.vmem_to_hbm [thread:$0]  %s82_s6, 128, %s231_s2, [#allocation4]  }
  0x42   :  { %171 = dma.done.wait [#allocation4], 128  }
  0x43   :  { %172 = vsyncadd [#allocation4], 4294967168 }
  0x44   :  { %88 = vsyncpa [#allocation3], 1 }
  0x45   :  { %89 = vsyncpa [#allocation6], 1 }
  0x46   :  { %90 = vsyncpa [#allocation4], 1 }

</bundles_post_ra>
